<compile_context>
chip_gen: v5e
topology: v5e:2x2
jax: 0.10.0
libtpu: 0.0.40
codegen_flags: <defaults>
</compile_context>

<pallas_src>
import functools
import math

import jax
import jax.numpy as jnp
import numpy as np
from jax import lax
from jax.experimental import pallas as pl
from jax.experimental.pallas import tpu as pltpu

_WIDTHS = (1024, 512, 256, 128)          # lane-dense last-dim candidates
TARGET_BLOCK_BYTES = 4 * 1024 * 1024     # per-block target for streaming passes
FUSED_OUT_TILE_BYTES = 2 * 1024 * 1024   # output tile for the fused path


def _derive_limits():
    """Per-chip VMEM limit and single-pass (fused) size threshold."""
    try:
        phys = int(pltpu.get_tpu_info().vmem_capacity_bytes)
    except Exception:
        phys = 64 * 1024 * 1024                       # conservative (v7x)
    if phys >= 128 * 1024 * 1024:                     # v5e / v6e
        vmem_limit = 80 * 1024 * 1024
    else:                                             # v7x: 64 MiB physical
        vmem_limit = max(phys // 2, phys - 16 * 1024 * 1024)
    # Budget: resident input (x2 buffers) + tiled output (x2) + f32 temps.
    fuse_bytes = max(4 * 1024 * 1024, (vmem_limit - 16 * 1024 * 1024) // 3)
    return vmem_limit, fuse_bytes


VMEM_LIMIT, FUSE_BYTES = _derive_limits()


# --------------------------------------------------------------------------- #
# In-kernel helpers
# --------------------------------------------------------------------------- #
def _group_sums(x_ref, n_groups, pivot):
    """Sum (x - pivot) and (x - pivot)^2 over 8-row groups into (8, width).

    Loop carries live in vregs, so each input vreg costs one load and a few
    VPU ops with zero extra vector stores (the vst slot stays free for DMA).
    """
    width = x_ref.shape[1]
    zero = jnp.zeros((8, width), jnp.float32)

    def body(j, carry):
        ps, pss = carry
        r = pl.multiple_of(j * 8, 8)
        xx = x_ref[pl.ds(r, 8), :].astype(jnp.float32) - pivot
        return ps + xx, pss + xx * xx

    return lax.fori_loop(0, n_groups, body, (zero, zero))


def _finalize_stats(s, ss, pivot, ovr_ref, *, npad, inv_n, inv_nm1,
                    use_mean_ovr, use_std_ovr):
    """Turn shifted sums into [mean, 1/std], honoring static overrides."""
    s = s + npad * pivot                  # padded zeros contributed (-pivot) each
    ss = ss - npad * (pivot * pivot)      # ... and pivot^2 each
    data_mean = pivot + s * inv_n
    var = (ss - s * s * inv_n) * inv_nm1  # unbiased (ddof=1); NaN when n == 1
    mean = ovr_ref[0] if use_mean_ovr else data_mean
    inv_std = (1.0 / ovr_ref[1]) if use_std_ovr else 1.0 / jnp.sqrt(var)
    return mean, inv_std


# --------------------------------------------------------------------------- #
# Kernels
# --------------------------------------------------------------------------- #
def _fused_kernel(pivot_ref, ovr_ref, x_ref, o_ref, stats_ref, *,
                  npad, inv_n, inv_nm1, n_groups, block_rows,
                  use_mean_ovr, use_std_ovr):
    """Single-HBM-read path: x resident, stats at step 0, output tiled over i."""
    i = pl.program_id(0)

    @pl.when(i == 0)
    def _():
        pivot = pivot_ref[0]
        ps, pss = _group_sums(x_ref, n_groups, pivot)
        mean, inv_std = _finalize_stats(
            jnp.sum(ps), jnp.sum(pss), pivot, ovr_ref,
            npad=npad, inv_n=inv_n, inv_nm1=inv_nm1,
            use_mean_ovr=use_mean_ovr, use_std_ovr=use_std_ovr)
        stats_ref[0] = mean
        stats_ref[1] = inv_std

    mean = stats_ref[0]
    inv_std = stats_ref[1]
    r = pl.multiple_of(i * block_rows, 8)
    xt = x_ref[pl.ds(r, block_rows), :].astype(jnp.float32)
    o_ref[...] = ((xt - mean) * inv_std).astype(o_ref.dtype)


def _reduce_kernel(pivot_ref, ovr_ref, x_ref, stats_ref, sum_acc, sq_acc, *,
                   npad, inv_n, inv_nm1, n_groups, use_mean_ovr, use_std_ovr):
    """Tiled reduction with small (8, width) accumulators; emits [mean, 1/std]."""
    i = pl.program_id(0)

    @pl.when(i == 0)
    def _():
        sum_acc[...] = jnp.zeros_like(sum_acc)
        sq_acc[...] = jnp.zeros_like(sq_acc)

    pivot = pivot_ref[0]
    ps, pss = _group_sums(x_ref, n_groups, pivot)
    sum_acc[...] = sum_acc[...] + ps          # one scratch += per tile
    sq_acc[...] = sq_acc[...] + pss

    @pl.when(i == pl.num_programs(0) - 1)
    def _():
        mean, inv_std = _finalize_stats(
            jnp.sum(sum_acc[...]), jnp.sum(sq_acc[...]), pivot, ovr_ref,
            npad=npad, inv_n=inv_n, inv_nm1=inv_nm1,
            use_mean_ovr=use_mean_ovr, use_std_ovr=use_std_ovr)
        stats_ref[0] = mean
        stats_ref[1] = inv_std


def _normalize_kernel(stats_ref, x_ref, o_ref):
    """Elementwise (x - mean) * inv_std with scalars read from SMEM."""
    mean = stats_ref[0]
    inv_std = stats_ref[1]
    o_ref[...] = ((x_ref[...].astype(jnp.float32) - mean) * inv_std).astype(o_ref.dtype)


# --------------------------------------------------------------------------- #
# Layout helpers (compile-time Python)
# --------------------------------------------------------------------------- #
def _choose_layout(n):
    """Lane-dense (rows, width) view with rows % 8 == 0; pad only if required."""
    lanes = -(-n // 128) * 128
    for w in _WIDTHS:                        # prefer a pad-free layout
        if lanes % (8 * w) == 0:
            return lanes, lanes // w, w
    for w in _WIDTHS:                        # fallback: round rows up to 8
        if lanes % w == 0:
            rows = -(-(lanes // w) // 8) * 8
            return rows * w, rows, w
    rows = -(-(lanes // 128) // 8) * 8       # unreachable (128 always divides)
    return rows * 128, rows, 128


def _pick_block_rows(rows, width, itemsize, target_bytes):
    """Largest divisor of `rows` that is a multiple of 8 and <= target size."""
    row_bytes = width * itemsize
    max_rows = max(8, (target_bytes // row_bytes) // 8 * 8)
    if rows <= max_rows:
        return rows
    m = rows // 8
    kmax = max(1, max_rows // 8)
    best = 1
    for d in range(1, math.isqrt(m) + 1):
        if m % d == 0:
            for k in (d, m // d):
                if best < k <= kmax:
                    best = k
    return 8 * best


def _normalize_call(stats, x2d, rows, width, block_rows, nblk, out_dtype,
                    cp, smem_spec):
    return pl.pallas_call(
        _normalize_kernel,
        out_shape=jax.ShapeDtypeStruct((rows, width), out_dtype),
        grid=(nblk,),
        in_specs=[smem_spec,
                  pl.BlockSpec((block_rows, width), lambda i: (i, 0))],
        out_specs=pl.BlockSpec((block_rows, width), lambda i: (i, 0)),
        compiler_params=cp,
    )(stats, x2d)


# --------------------------------------------------------------------------- #
# Public wrapper
# --------------------------------------------------------------------------- #
def z_score(x, mean=None, std=None, *, _fuse_bytes=None, _target_block_bytes=None):
    """Pallas TPU implementation of z_score.forward(tensor, mean, std)."""
    orig_shape = x.shape
    orig_dtype = x.dtype
    n = int(x.size)
    itemsize = jnp.dtype(orig_dtype).itemsize

    fuse_bytes = FUSE_BYTES if _fuse_bytes is None else _fuse_bytes
    target_bytes = (TARGET_BLOCK_BYTES if _target_block_bytes is None
                    else _target_block_bytes)

    need_mean = mean is None
    need_std = std is None
    need_stats = need_mean or need_std

    total, rows, width = _choose_layout(n)
    flat = x.reshape(-1)
    pivot_src = flat
    if total != n:                            # rare: not (8*width)-tileable
        flat = jnp.pad(flat, (0, total - n))
    x2d = flat.reshape(rows, width)

    inv_n = 1.0 / float(n)
    # n == 1 -> NaN on purpose: matches torch.std(tensor) with ddof=1.
    inv_nm1 = 1.0 / float(n - 1) if n > 1 else float("nan")
    npad = float(total - n)

    cp_seq = pltpu.CompilerParams(dimension_semantics=("arbitrary",),
                                  vmem_limit_bytes=VMEM_LIMIT)
    cp_par = pltpu.CompilerParams(dimension_semantics=("parallel",),
                                  vmem_limit_bytes=VMEM_LIMIT)
    smem_spec = pl.BlockSpec(memory_space=pltpu.MemorySpace.SMEM)

    if need_stats:
        # Scalars handed to the kernels: pivot (shift point) and overrides.
        pivot = pivot_src[:1].astype(jnp.float32)       # one element, not a pass
        ovr = jnp.stack([
            jnp.asarray(0.0 if need_mean else mean, jnp.float32).reshape(()),
            jnp.asarray(1.0 if need_std else std, jnp.float32).reshape(()),
        ])

        if total * itemsize <= fuse_bytes:
            # ---------------- fused single-HBM-read path ----------------
            block_rows = _pick_block_rows(rows, width, itemsize,
                                          min(target_bytes, FUSED_OUT_TILE_BYTES))
            nblk = rows // block_rows
            out2d = pl.pallas_call(
                functools.partial(
                    _fused_kernel, npad=npad, inv_n=inv_n, inv_nm1=inv_nm1,
                    n_groups=rows // 8, block_rows=block_rows,
                    use_mean_ovr=not need_mean, use_std_ovr=not need_std),
                out_shape=jax.ShapeDtypeStruct((rows, width), orig_dtype),
                grid=(nblk,),
                in_specs=[smem_spec, smem_spec,
                          pl.BlockSpec((rows, width), lambda i: (0, 0))],
                out_specs=pl.BlockSpec((block_rows, width), lambda i: (i, 0)),
                scratch_shapes=[pltpu.SMEM((2,), jnp.float32)],
                compiler_params=cp_seq,
            )(pivot, ovr, x2d)
        else:
            # ---------------- two-pass path: reduce, then normalize -----
            block_rows = _pick_block_rows(rows, width, itemsize, target_bytes)
            nblk = rows // block_rows
            stats = pl.pallas_call(
                functools.partial(
                    _reduce_kernel, npad=npad, inv_n=inv_n, inv_nm1=inv_nm1,
                    n_groups=block_rows // 8,
                    use_mean_ovr=not need_mean, use_std_ovr=not need_std),
                out_shape=jax.ShapeDtypeStruct((2,), jnp.float32),
                grid=(nblk,),
                in_specs=[smem_spec, smem_spec,
                          pl.BlockSpec((block_rows, width), lambda i: (i, 0))],
                out_specs=smem_spec,
                scratch_shapes=[pltpu.VMEM((8, width), jnp.float32),
                                pltpu.VMEM((8, width), jnp.float32)],
                compiler_params=cp_seq,
            )(pivot, ovr, x2d)
            out2d = _normalize_call(stats, x2d, rows, width, block_rows, nblk,
                                    orig_dtype, cp_par, smem_spec)
    else:
        # Both mean and std supplied: single streaming normalize pass.
        block_rows = _pick_block_rows(rows, width, itemsize, target_bytes)
        nblk = rows // block_rows
        stats = jnp.stack([jnp.asarray(mean, jnp.float32).reshape(()),
                           1.0 / jnp.asarray(std, jnp.float32).reshape(())])
        out2d = _normalize_call(stats, x2d, rows, width, block_rows, nblk,
                                orig_dtype, cp_par, smem_spec)

    if total != n:
        out2d = out2d.reshape(-1)[:n]
    return out2d.reshape(orig_shape)


# --------------------------------------------------------------------------- #
# Self-test (references computed in float64 with numpy)
# --------------------------------------------------------------------------- #
def _ref(arr, mean=None, std=None):
    a = np.asarray(arr, np.float64)
    m = float(np.mean(a)) if mean is None else float(mean)
    s = float(np.std(a, ddof=1)) if std is None else float(std)
    return (a - m) / s


def _check(out, ref, atol=1e-4, rtol=1e-4):
    assert np.allclose(np.asarray(out, np.float64), ref, atol=atol, rtol=rtol)


if __name__ == "__main__":
    key = jax.random.PRNGKey(0)
    k1, k2, k3 = jax.random.split(key, 3)

    x = jax.random.normal(k1, (2, 4, 16, 16), dtype=jnp.float32) * 3.0 + 1.5

    # 1) mean/std computed in-kernel (fused single-read path).
    out = jax.block_until_ready(z_score(x))
    assert out.shape == x.shape and out.dtype == x.dtype
    _check(out, _ref(x))

    # 2) user-supplied mean and std (streaming normalize-only path).
    out2 = jax.block_until_ready(z_score(x, mean=1.5, std=3.0))
    _check(out2, _ref(x, mean=1.5, std=3.0))

    # 3) mean supplied, std computed (fused path with mean override).
    out3 = jax.block_until_ready(z_score(x, mean=0.0))
    _check(out3, _ref(x, mean=0.0))

    # 4) size not a multiple of 128 (padding fallback path).
    y = jax.random.normal(k2, (3, 5, 7), dtype=jnp.float32) * 2.0 - 0.7
    out4 = jax.block_until_ready(z_score(y))
    _check(out4, _ref(y))

    # 5) force the large-tensor two-pass path (reduce + normalize kernels),
    #    with a large mean to exercise the cancellation-stable shifted sums.
    z = jax.random.normal(k3, (4, 4, 64, 64), dtype=jnp.float32) * 5.0 + 100.0
    out5 = jax.block_until_ready(
        z_score(z, _fuse_bytes=0, _target_block_bytes=32 * 1024))
    _check(out5, _ref(z))

    # 6) std supplied, mean computed, forced through the two-pass path.
    out6 = jax.block_until_ready(z_score(x, std=3.0, _fuse_bytes=0))
    _check(out6, _ref(x, std=3.0))

    print("KERNEL_OK")
</pallas_src>

<mosaic_0001>
module attributes {stable_mosaic.version = 11 : i64} {
  func.func @_fused_kernel(%arg0: i32, %arg1: memref<1xf32, #tpu.memory_space<smem>>, %arg2: memref<2xf32, #tpu.memory_space<smem>>, %arg3: memref<8x256xf32, #tpu.memory_space<vmem>>, %arg4: memref<8x256xf32, #tpu.memory_space<vmem>>, %arg5: memref<2xf32, #tpu.memory_space<smem>>) attributes {dimension_semantics = [#tpu.dimension_semantics<arbitrary>], iteration_bounds = array<i64: 1>, scalar_prefetch = 0 : i64, scratch_operands = 1 : i64, tpu.core_type = #tpu.core_type<tc>, window_params = [{transform_indices = @transform_0, window_bounds = array<i64: 1>}, {transform_indices = @transform_1, window_bounds = array<i64: 2>}, {pipeline_mode = #tpu.pipeline_mode<synchronous>, transform_indices = @transform_2, window_bounds = array<i64: 8, 256>}, {transform_indices = @transform_3, window_bounds = array<i64: 8, 256>}]} {
    %c0_i32 = arith.constant 0 : i32
    %0 = arith.cmpi eq, %arg0, %c0_i32 : i32
    %1 = arith.extui %0 : i1 to i32
    %c0_i32_0 = arith.constant 0 : i32
    %2 = arith.cmpi ne, %1, %c0_i32_0 : i32
    scf.if %2 {
      %c0_4 = arith.constant 0 : index
      %14 = memref.load %arg1[%c0_4] : memref<1xf32, #tpu.memory_space<smem>>
      %cst = arith.constant 0.000000e+00 : f32
      %15 = vector.broadcast %cst : f32 to vector<8x256xf32>
      %c0_i32_5 = arith.constant 0 : i32
      %c8_i32_6 = arith.constant 8 : i32
      %16 = arith.muli %c0_i32_5, %c8_i32_6 : i32
      %17 = tpu.assume_multiple %16, 8 : i32
      %18 = arith.index_cast %17 : i32 to index
      %c0_7 = arith.constant 0 : index
      %19 = vector.load %arg3[%18, %c0_7] : memref<8x256xf32, #tpu.memory_space<vmem>>, vector<8x256xf32>
      %20 = vector.broadcast %14 : f32 to vector<8x256xf32>
      %21 = arith.subf %19, %20 : vector<8x256xf32>
      %22 = arith.addf %15, %21 : vector<8x256xf32>
      %23 = arith.mulf %21, %21 : vector<8x256xf32>
      %24 = arith.addf %15, %23 : vector<8x256xf32>
      %c1_i32 = arith.constant 1 : i32
      %25 = vector.shape_cast %22 : vector<8x256xf32> to vector<1x8x256xf32>
      %cst_8 = arith.constant dense<0.000000e+00> : vector<1xf32>
      %26 = vector.multi_reduction <add>, %25, %cst_8 [1, 2] : vector<1x8x256xf32> to vector<1xf32>
      %27 = vector.shape_cast %26 : vector<1xf32> to vector<1x1x1xf32>
      %28 = vector.extract %27[0, 0, 0] : f32 from vector<1x1x1xf32>
      %29 = vector.shape_cast %24 : vector<8x256xf32> to vector<1x8x256xf32>
      %cst_9 = arith.constant dense<0.000000e+00> : vector<1xf32>
      %30 = vector.multi_reduction <add>, %29, %cst_9 [1, 2] : vector<1x8x256xf32> to vector<1xf32>
      %31 = vector.shape_cast %30 : vector<1xf32> to vector<1x1x1xf32>
      %32 = vector.extract %31[0, 0, 0] : f32 from vector<1x1x1xf32>
      %cst_10 = arith.constant 0.000000e+00 : f32
      %33 = arith.mulf %cst_10, %14 : f32
      %34 = arith.addf %28, %33 : f32
      %35 = arith.mulf %14, %14 : f32
      %cst_11 = arith.constant 0.000000e+00 : f32
      %36 = arith.mulf %cst_11, %35 : f32
      %37 = arith.subf %32, %36 : f32
      %cst_12 = arith.constant 4.8828125E-4 : f32
      %38 = arith.mulf %34, %cst_12 : f32
      %39 = arith.addf %14, %38 : f32
      %40 = arith.mulf %34, %34 : f32
      %cst_13 = arith.constant 4.8828125E-4 : f32
      %41 = arith.mulf %40, %cst_13 : f32
      %42 = arith.subf %37, %41 : f32
      %cst_14 = arith.constant 4.88519785E-4 : f32
      %43 = arith.mulf %42, %cst_14 : f32
      %44 = math.sqrt %43 : f32
      %cst_15 = arith.constant 1.000000e+00 : f32
      %45 = arith.divf %cst_15, %44 : f32
      %c0_16 = arith.constant 0 : index
      %46 = memref.load %arg5[%c0_16] : memref<2xf32, #tpu.memory_space<smem>>
      memref.store %39, %arg5[%c0_16] : memref<2xf32, #tpu.memory_space<smem>>
      %c1_17 = arith.constant 1 : index
      %47 = memref.load %arg5[%c1_17] : memref<2xf32, #tpu.memory_space<smem>>
      memref.store %45, %arg5[%c1_17] : memref<2xf32, #tpu.memory_space<smem>>
    } else {
    }
    %c0 = arith.constant 0 : index
    %3 = memref.load %arg5[%c0] : memref<2xf32, #tpu.memory_space<smem>>
    %c1 = arith.constant 1 : index
    %4 = memref.load %arg5[%c1] : memref<2xf32, #tpu.memory_space<smem>>
    %c8_i32 = arith.constant 8 : i32
    %5 = arith.muli %arg0, %c8_i32 : i32
    %6 = tpu.assume_multiple %5, 8 : i32
    %7 = arith.index_cast %6 : i32 to index
    %c0_1 = arith.constant 0 : index
    %8 = vector.load %arg3[%7, %c0_1] : memref<8x256xf32, #tpu.memory_space<vmem>>, vector<8x256xf32>
    %9 = vector.broadcast %3 : f32 to vector<8x256xf32>
    %10 = arith.subf %8, %9 : vector<8x256xf32>
    %11 = vector.broadcast %4 : f32 to vector<8x256xf32>
    %12 = arith.mulf %10, %11 : vector<8x256xf32>
    %c0_2 = arith.constant 0 : index
    %c0_3 = arith.constant 0 : index
    %13 = vector.load %arg4[%c0_2, %c0_3] : memref<8x256xf32, #tpu.memory_space<vmem>>, vector<8x256xf32>
    tpu.vector_store %arg4[%c0_2, %c0_3], %12 {strides = array<i32>} : memref<8x256xf32, #tpu.memory_space<vmem>>, vector<8x256xf32>,
    return
  }
  func.func @transform_0(%arg0: i32) -> i32 {
    %c0_i32 = arith.constant 0 : i32
    %c0_i32_0 = arith.constant 0 : i32
    return %c0_i32 : i32
  }
  func.func @transform_1(%arg0: i32) -> i32 {
    %c0_i32 = arith.constant 0 : i32
    %c0_i32_0 = arith.constant 0 : i32
    return %c0_i32 : i32
  }
  func.func @transform_2(%arg0: i32) -> (i32, i32) {
    %c0_i32 = arith.constant 0 : i32
    %c0_i32_0 = arith.constant 0 : i32
    %c0_i32_1 = arith.constant 0 : i32
    return %c0_i32, %c0_i32_0 : i32, i32
  }
  func.func @transform_3(%arg0: i32) -> (i32, i32) {
    %c0_i32 = arith.constant 0 : i32
    %c0_i32_0 = arith.constant 0 : i32
    return %arg0, %c0_i32 : i32, i32
  }
}

</mosaic_0001>

<bundles_post_ra>
// kernel: tpu_custom_call.1
= control target key start
LH: loop header
LB: loop body
LE: loop exit
PB: predicated region body
PF: predicated region fallthrough
CT: control target
= control target key end

     0   :  { %9 = vsyncpa [#allocation7], 0  ;;  %s305_s0 = inlined_call_operand.<no memory space> [shape: f32[1], index: 0, kind: input, shape index: {}]   ;;  %s306_s1 = inlined_call_operand.vmem [shape: f32[2], index: 1, kind: input, shape index: {}]   ;;  %s307_s2 = inlined_call_operand.hbm [shape: f32[8,256], index: 2, kind: input, shape index: {}]   ;;  %s308_s3 = inlined_call_operand.hbm [shape: f32[8,256], index: 3, kind: output, shape index: {}]  }
   0x1   :  { %10 = vsyncpa [#allocation5], 0 }
   0x2   :  { %11 = vsyncpa [#allocation6], 0  ;;  %s19_s14 = sshll.u32 %s306_s1, 4  ;;  %s28_s17 = sshll.u32 %s307_s2, 4  ;;  %s20_s14 = int_to_ptr.vmem [resolvable:$true] %s19_s14  ;;  %s29_s17 = int_to_ptr.hbm [resolvable:$true] %s28_s17 }
   0x3   :  { %s247_s18 = smov [#allocation4]   ;;  %s248_s19 = smov [#allocation8]  }
   0x4   :  { %22 = dma.vmem_to_smem %s20_s14, 16, %s247_s18, [#allocation7]  }
   0x5   :  { %s30_s20 = sshll.u32 %s248_s19, 4  ;;  %s31_s20 = int_to_ptr.vmem [resolvable:$true] %s30_s20 }
   0x6   :  { %33 = dma.hbm_to_vmem [thread:$0]  %s29_s17, 256, %s31_s20, [#allocation5]  }
   0x7   :  { %241 = dma.done.wait [#allocation7], 16  }
   0x8   :  { %242 = vsyncadd [#allocation7], 4294967280 }
   0x9   :  { %243 = dma.done.wait [#allocation5], 256  }
   0xa   :  { %244 = vsyncadd [#allocation5], 4294967040 }
   0xb   :  { %42 = sfence }
   0xc   :  { %v276_v0 = vld [vmem:[#allocation8] sm:$0xff]  ;;  %v278_v1 = vld [vmem:[#allocation8 + $0x8] sm:$0xff]  ;;  %v53_v2 = vstv %s305_s0  ;;  %s82_s23 = smul.f32 0.0, %s305_s0  ;;  %s249_s14 = smov [#allocation9]  }
   0xd   :  { %v54_v3 = vsub.f32 %v276_v0, %v53_v2  ;;  %v55_v4 = vsub.f32 %v278_v1, %v53_v2  ;;  %s84_s27 = smul.f32 %s305_s0, %s305_s0  ;;  %s150_s15 = sshll.u32 %s249_s14, 4  ;;  %s151_s15 = int_to_ptr.vmem [resolvable:$true] %s150_s15 }
   0xe   :  { %s152_s19 = sshll.u32 %s308_s3, 4  ;;  %s153_s19 = int_to_ptr.hbm [resolvable:$true] %s152_s19 }
   0xf   :  { %v62_v5 = vadd.f32 %v55_v4, %v54_v3  ;;  %v58_v6 = vmul.f32 %v54_v3, %v54_v3  ;;  %v59_v7 = vmul.f32 %v55_v4, %v55_v4  ;;  %s85_s29 = smul.f32 0.0, %s84_s27 }
  0x11   :  { %63 = vadd.xlane.f32.xlu0 %v62_v5  ;;  %v72_v8 = vadd.f32 %v59_v7, %v58_v6 }
  0x19   :  { %73 = vadd.xlane.f32.xlu0 %v72_v8 }
  0x84   :  { %v64_v9 = vpop.xlane.xlu0 %63 }
  0x85   :  { %v65_v10 = vrot.slane %v64_v9, 4 }
  0x87   :  { %v66_v11 = vadd.f32 %v65_v10, %v64_v9 }
  0x89   :  { %v67_v12 = vrot.slane %v66_v11, 2 }
  0x8b   :  { %v68_v13 = vadd.f32 %v67_v12, %v66_v11 }
  0x8c   :  { %v74_v14 = vpop.xlane.xlu0 %73 }
  0x8d   :  { %v75_v15 = vrot.slane %v74_v14, 4  ;;  %v69_v16 = vrot.slane %v68_v13, 1 }
  0x8f   :  { %v76_v17 = vadd.f32 %v75_v15, %v74_v14  ;;  %v70_v18 = vadd.f32 %v69_v16, %v68_v13 }
  0x91   :  { %v77_v19 = vrot.slane %v76_v17, 2  ;;  %166 = vpush %v70_v18 }
  0x93   :  { %v78_v20 = vadd.f32 %v77_v19, %v76_v17 }
  0x95   :  { %v79_v21 = vrot.slane %v78_v20, 1 }
  0x97   :  { %v80_v22 = vadd.f32 %v79_v21, %v78_v20 }
  0x99   :  { %168 = vpush %v80_v22 }
  0xc2   :  { %s167_s24 = spop %166 }
  0xc3   :  { %s292_s28 = sadd.f32 %s167_s24, %s82_s23 }
  0xc5   :  { %s89_s30 = smul.f32 %s292_s28, %s292_s28 }
  0xc6   :  { %s87_s10 = smul.f32 0.00048828125, %s292_s28 }
  0xc7   :  { %s90_s5 = smul.f32 0.00048828125, %s89_s30 }
  0xc8   :  { %s88_s13 = sadd.f32 %s87_s10, %s305_s0 }
  0xca   :  { %s169_s4 = spop %168  ;;  %v137_v45 = vstv %s88_s13 }
  0xcb   :  { %s86_s6 = ssub.f32 %s169_s4, %s85_s29  ;;  %v138_v46 = vsub.f32 %v276_v0, %v137_v45  ;;  %v139_v47 = vsub.f32 %v278_v1, %v137_v45 }
  0xcd   :  { %s91_s7 = ssub.f32 %s86_s6, %s90_s5 }
  0xcf   :  { %s92_s8 = smul.f32 0.0004885198, %s91_s7 }
  0xd1   :  { %v93_v23 = vstv %s92_s8 }
  0xd2   :  { %177 = vrsqrt.f32 %v93_v23  ;;  %vm101_vm0 = vcmp.eq.f32.partialorder %v93_v23, inf  ;;  %v104_v31 = vand.u32 2147483648, %v93_v23  ;;  %vm103_vm1 = vcmp.eq.f32.partialorder %v93_v23, 0.0 }
  0xd8   :  { %v178_v24 = vpop.eup %177 }
  0xd9   :  { %v95_v25 = vmul.f32 %v178_v24, %v93_v23 }
  0xdb   :  { %v96_v26 = vmul.f32 %v178_v24, %v95_v25 }
  0xdd   :  { %v97_v27 = vmul.f32 0.5, %v96_v26 }
  0xdf   :  { %v98_v28 = vsub.f32 1.5, %v97_v27 }
  0xe1   :  { %v99_v29 = vmul.f32 %v178_v24, %v98_v28 }
  0xe3   :  { %v100_v30 = vmul.f32 %v99_v29, %v93_v23 }
  0xe5   :  { %v102_v32 = vsel %vm101_vm0, %v93_v23, %v100_v30 }
  0xe6   :  { %v105_v33 = vsel %vm103_vm1, %v104_v31, %v102_v32 }
  0xe7   :  { %170 = vpush %v105_v33 }
 0x118   :  { %s171_s9 = spop %170 }
 0x119   :  { %v107_v34 = vstv %s171_s9 }
 0x11a   :  { %179 = vrcp.f32 %v107_v34  ;;  %v119_v38 = vand.u32 2147483648, %v107_v34  ;;  %v117_v40 = vand.u32 2147483647, %v107_v34  ;;  %vm113_vm3 = vweird.f32 %v107_v34 }
 0x11c   :  { %v120_v42 = vor.u32 1.1754944e-38, %v119_v38  ;;  %vm118_vm5 = vcmp.eq.f32.partialorder %v117_v40, 8.507059e+37 }
 0x120   :  { %v180_v35 = vpop.eup %179 }
 0x121   :  { %v109_v36 = vmul.f32 %v180_v35, %v107_v34  ;;  %vm114_vm2 = vweird.f32 %v180_v35 }
 0x122   :  { %vm115_vm4 = vmor %vm113_vm3, %vm114_vm2 }
 0x123   :  { %v110_v37 = vsub.f32 1.0, %v109_v36 }
 0x125   :  { %v111_v39 = vmul.f32 %v180_v35, %v110_v37 }
 0x127   :  { %v112_v41 = vadd.f32 %v180_v35, %v111_v39 }
 0x129   :  { %v116_v43 = vsel %vm115_vm4, %v180_v35, %v112_v41 }
 0x12a   :  { %v121_v44 = vsel %vm118_vm5, %v120_v42, %v116_v43 }
 0x12b   :  { %172 = vpush %v121_v44 }
 0x15c   :  { %s173_s16 = spop %172 }
 0x15d   :  { %v140_v48 = vstv %s173_s16 }
 0x15e   :  { %v141_v49 = vmul.f32 %v140_v48, %v138_v46  ;;  %v142_v50 = vmul.f32 %v140_v48, %v139_v47 }
 0x160   :  { %143 = vst [vmem:[#allocation9] sm:$0xff] %v141_v49 }
 0x161   :  { %144 = vst [vmem:[#allocation9 + $0x8] sm:$0xff] %v142_v50 }
 0x162   :  { %155 = dma.vmem_to_hbm [thread:$0]  %s151_s15, 256, %s153_s19, [#allocation6]  }
 0x163   :  { %245 = dma.done.wait [#allocation6], 256  }
 0x164   :  { %246 = vsyncadd [#allocation6], 4294967040 }
 0x165   :  { %160 = vsyncpa [#allocation5], 1 }
 0x166   :  { %161 = vsyncpa [#allocation6], 1 }
 0x167   :  { %162 = vsyncpa [#allocation7], 1 }

</bundles_post_ra>
